<compile_context>
chip_gen: v7x
topology: tpu7x:2x2x1
jax: 0.10.0
libtpu: 0.0.40
codegen_flags: <defaults>
</compile_context>

<pallas_src>
import functools

import jax
import jax.numpy as jnp
import numpy as np
from jax.experimental import pallas as pl
from jax.experimental.pallas import tpu as pltpu


def _round_up(x, m):
    return (x + m - 1) // m * m


def _chip_defaults():
    """(vmem_limit_bytes, default phase-A tile_m) sized per TPU generation."""
    vmem_cap = None
    try:
        vmem_cap = getattr(pltpu.get_tpu_info(), "vmem_capacity_bytes", None)
    except Exception:
        vmem_cap = None
    if vmem_cap is not None and vmem_cap >= 100 * 1024 * 1024:
        # v5e / v6e: 128 MiB physical VMEM -> larger scoped limit and tiles.
        return 64 * 1024 * 1024, 512
    # v7x (64 MiB per TensorCore) or unknown backend: stay conservative.
    return 32 * 1024 * 1024, 256


_VMEM_LIMIT, _DEFAULT_TILE_M = _chip_defaults()


# ---------------------------------------------------------------------------
# Phase A kernels
# ---------------------------------------------------------------------------
def _bn_matmul_kernel(p_ref, w_ref, y_ref, sum_ref, sq_ref):
    """(tile_m, K) @ (K, cout_pad) matmul + per-tile BN statistic partials."""
    y = jnp.dot(p_ref[...], w_ref[...], preferred_element_type=jnp.float32)
    y_ref[...] = y.astype(y_ref.dtype)          # store in compute_dtype
    tm, cp = y.shape
    if tm % 64 == 0:
        # Chunked one-pass stats: 8 sublane-aligned row chunks keep the y*y
        # live set small; the 8 partials fill the (8, cout_pad) output block.
        rows = tm // 8
        sums, sqs = [], []
        for c in range(8):
            yc = y[c * rows:(c + 1) * rows]
            sums.append(jnp.sum(yc, axis=0, keepdims=True))
            sqs.append(jnp.sum(yc * yc, axis=0, keepdims=True))
        sum_ref[...] = jnp.concatenate(sums, axis=0)
        sq_ref[...] = jnp.concatenate(sqs, axis=0)
    else:
        zeros7 = jnp.zeros((7, cp), jnp.float32)
        sum_ref[...] = jnp.concatenate(
            [jnp.sum(y, axis=0, keepdims=True), zeros7], axis=0)
        sq_ref[...] = jnp.concatenate(
            [jnp.sum(y * y, axis=0, keepdims=True), zeros7], axis=0)


def _make_fused_bias_kernel(has_relu: bool):
    """No-BN path: conv matmul + bias (+ ReLU) fused into one kernel."""
    def kernel(p_ref, w_ref, shift_ref, o_ref):
        y = jnp.dot(p_ref[...], w_ref[...], preferred_element_type=jnp.float32)
        y = y + shift_ref[...]
        if has_relu:
            y = jnp.maximum(y, 0.0)
        o_ref[...] = y.astype(o_ref.dtype)
    return kernel


# ---------------------------------------------------------------------------
# Phase B kernel (BN path only): folded affine + optional ReLU
# ---------------------------------------------------------------------------
def _make_affine_kernel(has_relu: bool):
    def kernel(y_ref, scale_ref, shift_ref, o_ref):
        y = y_ref[...].astype(jnp.float32) * scale_ref[...] + shift_ref[...]
        if has_relu:
            y = jnp.maximum(y, 0.0)
        o_ref[...] = y.astype(o_ref.dtype)
    return kernel


# ---------------------------------------------------------------------------
# Wrapper
# ---------------------------------------------------------------------------
@functools.partial(
    jax.jit,
    static_argnames=("stride", "pad", "has_bn", "has_relu", "eps",
                     "compute_dtype", "tile_m"))
def conv_bn_relu_forward(x_nchw, w_oihw, bias, gamma, beta, *, stride=1,
                         pad=0, has_bn=True, has_relu=True, eps=1e-5,
                         compute_dtype=jnp.bfloat16, tile_m=None):
    """Forward pass of conv_bn_relu (groups=1). Returns NCHW output."""
    if tile_m is None:
        tile_m = _DEFAULT_TILE_M

    B, Cin, H, W = x_nchw.shape
    Cout, Cin_w, KH, KW = w_oihw.shape
    assert Cin == Cin_w, "groups=1 assumed"
    out_dtype = x_nchw.dtype

    if bias is None:
        bias = jnp.zeros((Cout,), jnp.float32)
    if gamma is None:
        gamma = jnp.ones((Cout,), jnp.float32)
    if beta is None:
        beta = jnp.zeros((Cout,), jnp.float32)

    # ---- glue: NCHW -> NHWC, spatial pad, im2col --------------------------
    x = jnp.transpose(x_nchw, (0, 2, 3, 1))
    if pad:
        x = jnp.pad(x, ((0, 0), (pad, pad), (pad, pad), (0, 0)))
    Hp, Wp = x.shape[1], x.shape[2]
    OH = (Hp - KH) // stride + 1
    OW = (Wp - KW) // stride + 1
    cols = []
    for kh in range(KH):
        for kw in range(KW):
            cols.append(x[:, kh:kh + OH * stride:stride,
                           kw:kw + OW * stride:stride, :])
    M = B * OH * OW
    K = KH * KW * Cin
    patches = jnp.stack(cols, axis=3).reshape(M, K)
    w_mat = jnp.transpose(w_oihw, (2, 3, 1, 0)).reshape(K, Cout)

    # ---- pad to TPU-friendly shapes ---------------------------------------
    LANE = 128
    cout_pad = _round_up(Cout, LANE)            # lane-dense output stores
    tile_m_a = min(tile_m, _round_up(M, 8))     # full tile fits small problems
    m_pad = _round_up(M, tile_m_a)
    num_tiles_a = m_pad // tile_m_a

    patches = jnp.pad(patches, ((0, m_pad - M), (0, 0))).astype(compute_dtype)
    w_mat = jnp.pad(w_mat, ((0, 0), (0, cout_pad - Cout))).astype(compute_dtype)

    def _pad_vec(v):
        return jnp.pad(v.astype(jnp.float32), (0, cout_pad - Cout))

    bias_p, gamma_p, beta_p = _pad_vec(bias), _pad_vec(gamma), _pad_vec(beta)

    p_spec = pl.BlockSpec((tile_m_a, K), lambda i: (i, 0))
    w_spec = pl.BlockSpec((K, cout_pad), lambda i: (0, 0))
    vec_spec = pl.BlockSpec((1, cout_pad), lambda i: (0, 0))
    parallel = pltpu.CompilerParams(
        dimension_semantics=("parallel",), vmem_limit_bytes=_VMEM_LIMIT)

    # ======================= no-BN path: fully fused =======================
    if not has_bn:
        out_flat = pl.pallas_call(
            _make_fused_bias_kernel(has_relu),
            out_shape=jax.ShapeDtypeStruct((m_pad, cout_pad), out_dtype),
            grid=(num_tiles_a,),
            in_specs=[p_spec, w_spec, vec_spec],
            out_specs=pl.BlockSpec((tile_m_a, cout_pad), lambda i: (i, 0)),
            compiler_params=parallel,
        )(patches, w_mat, bias_p.reshape(1, cout_pad))
        out = out_flat[:M, :Cout].reshape(B, OH, OW, Cout)
        return jnp.transpose(out, (0, 3, 1, 2))

    # ======================= BN path: two phases ===========================
    # Phase A: tiled matmul + per-tile stat partials (megacore-parallel).
    y_shape = jax.ShapeDtypeStruct((m_pad, cout_pad), compute_dtype)
    y_spec = pl.BlockSpec((tile_m_a, cout_pad), lambda i: (i, 0))
    stat_shape = jax.ShapeDtypeStruct((num_tiles_a * 8, cout_pad), jnp.float32)
    stat_spec = pl.BlockSpec((8, cout_pad), lambda i: (i, 0))

    y_pre, psum, psq = pl.pallas_call(
        _bn_matmul_kernel,
        out_shape=(y_shape, stat_shape, stat_shape),
        grid=(num_tiles_a,),
        in_specs=[p_spec, w_spec],
        out_specs=(y_spec, stat_spec, stat_spec),
        compiler_params=parallel,
    )(patches, w_mat)

    # Padded patch rows are zero, so their contribution to the sums is zero
    # and the statistics over the true M rows stay exact.
    csum = jnp.sum(psum, axis=0)
    csq = jnp.sum(psq, axis=0)
    mean = csum / M
    var = jnp.maximum(csq / M - mean * mean, 0.0)   # biased (training-mode BN)
    # TODO(synk): one-pass E[y^2]-E[y]^2 can lose precision when |mean|>>std;
    #             switch to a shifted / two-pass variance if tighter parity
    #             with PyTorch BN is required.
    rstd = jax.lax.rsqrt(var + eps)
    scale = gamma_p * rstd
    shift = beta_p - mean * scale
    # conv bias cancels exactly under training-mode BN mean subtraction.

    # Phase B: streaming affine + ReLU; group several phase-A tiles per step.
    max_group = max(1, min(num_tiles_a, 2048 // tile_m_a))
    group = 1
    for g in range(max_group, 0, -1):
        if num_tiles_a % g == 0:
            group = g
            break
    tile_m_b = group * tile_m_a
    num_tiles_b = num_tiles_a // group

    alias = ({0: 0} if jnp.dtype(compute_dtype) == jnp.dtype(out_dtype) else {})
    out_flat = pl.pallas_call(
        _make_affine_kernel(has_relu),
        out_shape=jax.ShapeDtypeStruct((m_pad, cout_pad), out_dtype),
        grid=(num_tiles_b,),
        in_specs=[pl.BlockSpec((tile_m_b, cout_pad), lambda i: (i, 0)),
                  vec_spec, vec_spec],
        out_specs=pl.BlockSpec((tile_m_b, cout_pad), lambda i: (i, 0)),
        input_output_aliases=alias,
        compiler_params=parallel,
    )(y_pre, scale.reshape(1, cout_pad), shift.reshape(1, cout_pad))

    out = out_flat[:M, :Cout].reshape(B, OH, OW, Cout)
    return jnp.transpose(out, (0, 3, 1, 2))  # back to NCHW


# ---------------------------------------------------------------------------
# Pure-JAX reference mirroring the PyTorch forward (training-mode BN)
# ---------------------------------------------------------------------------
def _reference(x, w, b, gamma, beta, *, stride, pad, has_bn, has_relu, eps=1e-5):
    y = jax.lax.conv_general_dilated(
        x, w, window_strides=(stride, stride),
        padding=((pad, pad), (pad, pad)),
        dimension_numbers=("NCHW", "OIHW", "NCHW"))
    y = y + b.reshape(1, -1, 1, 1)
    if has_bn:
        mean = jnp.mean(y, axis=(0, 2, 3), keepdims=True)
        var = jnp.mean((y - mean) ** 2, axis=(0, 2, 3), keepdims=True)
        y = (y - mean) * jax.lax.rsqrt(var + eps)
        y = y * gamma.reshape(1, -1, 1, 1) + beta.reshape(1, -1, 1, 1)
    if has_relu:
        y = jnp.maximum(y, 0.0)
    return y


if __name__ == "__main__":
    # conv_bn_relu(in_channel=4, out_channel=8, stride=1, kszie=3, pad=0,
    #              has_bn=True, has_relu=True, bias=True, groups=1)
    B, Cin, H, W = 2, 4, 16, 16
    Cout, Ksz = 8, 3
    stride, pad = 1, 0

    key = jax.random.PRNGKey(0)
    kx, kw, kb, kg, kbeta = jax.random.split(key, 5)
    x = jax.random.normal(kx, (B, Cin, H, W), dtype=jnp.float32)
    w = jax.random.normal(kw, (Cout, Cin, Ksz, Ksz), dtype=jnp.float32) * 0.1
    b = jax.random.normal(kb, (Cout,), dtype=jnp.float32) * 0.1
    gamma = 1.0 + 0.1 * jax.random.normal(kg, (Cout,), dtype=jnp.float32)
    beta = 0.1 * jax.random.normal(kbeta, (Cout,), dtype=jnp.float32)

    ref = jax.block_until_ready(
        _reference(x, w, b, gamma, beta, stride=stride, pad=pad,
                   has_bn=True, has_relu=True))

    # f32 compute path: strict parity with the PyTorch/XLA reference.
    out_f32 = jax.block_until_ready(
        conv_bn_relu_forward(x, w, b, gamma, beta, stride=stride, pad=pad,
                             has_bn=True, has_relu=True,
                             compute_dtype=jnp.float32))
    assert out_f32.shape == (B, Cout, H - Ksz + 1, W - Ksz + 1), out_f32.shape
    np.testing.assert_allclose(np.asarray(out_f32), np.asarray(ref),
                               rtol=1e-4, atol=2e-4)

    # bf16 MXU-input path (perf mode: bf16 patches, weights and y_pre store).
    out_bf16 = jax.block_until_ready(
        conv_bn_relu_forward(x, w, b, gamma, beta, stride=stride, pad=pad,
                             has_bn=True, has_relu=True,
                             compute_dtype=jnp.bfloat16))
    np.testing.assert_allclose(np.asarray(out_bf16), np.asarray(ref),
                               rtol=1e-1, atol=1e-1)

    # conv + bias + relu (no BN) variant: single fully fused kernel.
    ref_nobn = jax.block_until_ready(
        _reference(x, w, b, gamma, beta, stride=stride, pad=pad,
                   has_bn=False, has_relu=True))
    out_nobn = jax.block_until_ready(
        conv_bn_relu_forward(x, w, b, gamma, beta, stride=stride, pad=pad,
                             has_bn=False, has_relu=True,
                             compute_dtype=jnp.float32))
    np.testing.assert_allclose(np.asarray(out_nobn), np.asarray(ref_nobn),
                               rtol=1e-4, atol=2e-4)

    print("KERNEL_OK")
</pallas_src>

<mosaic_0001>
module attributes {stable_mosaic.version = 11 : i64} {
  func.func @kernel(%arg0: i32, %arg1: memref<512x128xf32, #tpu.memory_space<vmem>>, %arg2: memref<1x128xf32, #tpu.memory_space<vmem>>, %arg3: memref<1x128xf32, #tpu.memory_space<vmem>>, %arg4: memref<512x128xf32, #tpu.memory_space<vmem>>) attributes {dimension_semantics = [#tpu.dimension_semantics<parallel>], iteration_bounds = array<i64: 1>, scalar_prefetch = 0 : i64, scratch_operands = 0 : i64, tpu.core_type = #tpu.core_type<tc>, window_params = [{transform_indices = @transform_0, window_bounds = array<i64: 512, 128>}, {pipeline_mode = #tpu.pipeline_mode<synchronous>, transform_indices = @transform_1, window_bounds = array<i64: 1, 128>}, {pipeline_mode = #tpu.pipeline_mode<synchronous>, transform_indices = @transform_2, window_bounds = array<i64: 1, 128>}, {transform_indices = @transform_3, window_bounds = array<i64: 512, 128>}]} {
    %c0 = arith.constant 0 : index
    %c0_0 = arith.constant 0 : index
    %0 = vector.load %arg1[%c0, %c0_0] : memref<512x128xf32, #tpu.memory_space<vmem>>, vector<512x128xf32>
    %c0_1 = arith.constant 0 : index
    %c0_2 = arith.constant 0 : index
    %1 = vector.load %arg2[%c0_1, %c0_2] : memref<1x128xf32, #tpu.memory_space<vmem>>, vector<1x128xf32>
    %2 = vector.broadcast %1 : vector<1x128xf32> to vector<512x128xf32>
    %3 = arith.mulf %0, %2 : vector<512x128xf32>
    %c0_3 = arith.constant 0 : index
    %c0_4 = arith.constant 0 : index
    %4 = vector.load %arg3[%c0_3, %c0_4] : memref<1x128xf32, #tpu.memory_space<vmem>>, vector<1x128xf32>
    %5 = vector.broadcast %4 : vector<1x128xf32> to vector<512x128xf32>
    %6 = arith.addf %3, %5 : vector<512x128xf32>
    %cst = arith.constant 0.000000e+00 : f32
    %7 = vector.broadcast %cst : f32 to vector<512x128xf32>
    %8 = arith.maximumf %6, %7 : vector<512x128xf32>
    %c0_5 = arith.constant 0 : index
    %c0_6 = arith.constant 0 : index
    %9 = vector.load %arg4[%c0_5, %c0_6] : memref<512x128xf32, #tpu.memory_space<vmem>>, vector<512x128xf32>
    tpu.vector_store %arg4[%c0_5, %c0_6], %8 {strides = array<i32>} : memref<512x128xf32, #tpu.memory_space<vmem>>, vector<512x128xf32>,
    return
  }
  func.func @transform_0(%arg0: i32) -> (i32, i32) {
    %c0_i32 = arith.constant 0 : i32
    %c0_i32_0 = arith.constant 0 : i32
    return %arg0, %c0_i32 : i32, i32
  }
  func.func @transform_1(%arg0: i32) -> (i32, i32) {
    %c0_i32 = arith.constant 0 : i32
    %c0_i32_0 = arith.constant 0 : i32
    %c0_i32_1 = arith.constant 0 : i32
    return %c0_i32, %c0_i32_0 : i32, i32
  }
  func.func @transform_2(%arg0: i32) -> (i32, i32) {
    %c0_i32 = arith.constant 0 : i32
    %c0_i32_0 = arith.constant 0 : i32
    %c0_i32_1 = arith.constant 0 : i32
    return %c0_i32, %c0_i32_0 : i32, i32
  }
  func.func @transform_3(%arg0: i32) -> (i32, i32) {
    %c0_i32 = arith.constant 0 : i32
    %c0_i32_0 = arith.constant 0 : i32
    return %arg0, %c0_i32 : i32, i32
  }
}

module attributes {stable_mosaic.version = 11 : i64} {
  func.func @_bn_matmul_kernel(%arg0: i32, %arg1: memref<256x36xf32, #tpu.memory_space<vmem>>, %arg2: memref<36x128xf32, #tpu.memory_space<vmem>>, %arg3: memref<256x128xf32, #tpu.memory_space<vmem>>, %arg4: memref<8x128xf32, #tpu.memory_space<vmem>>, %arg5: memref<8x128xf32, #tpu.memory_space<vmem>>) attributes {dimension_semantics = [#tpu.dimension_semantics<parallel>], iteration_bounds = array<i64: 2>, scalar_prefetch = 0 : i64, scratch_operands = 0 : i64, tpu.core_type = #tpu.core_type<tc>, window_params = [{transform_indices = @transform_0, window_bounds = array<i64: 256, 36>}, {pipeline_mode = #tpu.pipeline_mode<synchronous>, transform_indices = @transform_1, window_bounds = array<i64: 36, 128>}, {transform_indices = @transform_2, window_bounds = array<i64: 256, 128>}, {transform_indices = @transform_3, window_bounds = array<i64: 8, 128>}, {transform_indices = @transform_4, window_bounds = array<i64: 8, 128>}]} {
    %c0 = arith.constant 0 : index
    %c0_0 = arith.constant 0 : index
    %0 = vector.load %arg1[%c0, %c0_0] : memref<256x36xf32, #tpu.memory_space<vmem>>, vector<256x36xf32>
    %c0_1 = arith.constant 0 : index
    %c0_2 = arith.constant 0 : index
    %1 = vector.load %arg2[%c0_1, %c0_2] : memref<36x128xf32, #tpu.memory_space<vmem>>, vector<36x128xf32>
    %cst = arith.constant dense<0.000000e+00> : vector<256x128xf32>
    %2 = tpu.matmul %0, %1, %cst {dimension_numbers = #tpu.dot_dimension_numbers<[1], [0], [0], [1], [0, 0, 1, 1], [], []>} : vector<256x36xf32>, vector<36x128xf32>, vector<256x128xf32> -> vector<256x128xf32>
    %c0_3 = arith.constant 0 : index
    %c0_4 = arith.constant 0 : index
    %3 = vector.load %arg3[%c0_3, %c0_4] : memref<256x128xf32, #tpu.memory_space<vmem>>, vector<256x128xf32>
    tpu.vector_store %arg3[%c0_3, %c0_4], %2 {strides = array<i32>} : memref<256x128xf32, #tpu.memory_space<vmem>>, vector<256x128xf32>,
    %4 = vector.extract_strided_slice %2 {offsets = [0, 0], sizes = [32, 128], strides = [1, 1]} : vector<256x128xf32> to vector<32x128xf32>
    %cst_5 = arith.constant dense<0.000000e+00> : vector<128xf32>
    %5 = vector.multi_reduction <add>, %4, %cst_5 [0] : vector<32x128xf32> to vector<128xf32>
    %6 = vector.shape_cast %5 : vector<128xf32> to vector<1x128xf32>
    %7 = arith.mulf %4, %4 : vector<32x128xf32>
    %cst_6 = arith.constant dense<0.000000e+00> : vector<128xf32>
    %8 = vector.multi_reduction <add>, %7, %cst_6 [0] : vector<32x128xf32> to vector<128xf32>
    %9 = vector.shape_cast %8 : vector<128xf32> to vector<1x128xf32>
    %10 = vector.extract_strided_slice %2 {offsets = [32, 0], sizes = [32, 128], strides = [1, 1]} : vector<256x128xf32> to vector<32x128xf32>
    %cst_7 = arith.constant dense<0.000000e+00> : vector<128xf32>
    %11 = vector.multi_reduction <add>, %10, %cst_7 [0] : vector<32x128xf32> to vector<128xf32>
    %12 = vector.shape_cast %11 : vector<128xf32> to vector<1x128xf32>
    %13 = arith.mulf %10, %10 : vector<32x128xf32>
    %cst_8 = arith.constant dense<0.000000e+00> : vector<128xf32>
    %14 = vector.multi_reduction <add>, %13, %cst_8 [0] : vector<32x128xf32> to vector<128xf32>
    %15 = vector.shape_cast %14 : vector<128xf32> to vector<1x128xf32>
    %16 = vector.extract_strided_slice %2 {offsets = [64, 0], sizes = [32, 128], strides = [1, 1]} : vector<256x128xf32> to vector<32x128xf32>
    %cst_9 = arith.constant dense<0.000000e+00> : vector<128xf32>
    %17 = vector.multi_reduction <add>, %16, %cst_9 [0] : vector<32x128xf32> to vector<128xf32>
    %18 = vector.shape_cast %17 : vector<128xf32> to vector<1x128xf32>
    %19 = arith.mulf %16, %16 : vector<32x128xf32>
    %cst_10 = arith.constant dense<0.000000e+00> : vector<128xf32>
    %20 = vector.multi_reduction <add>, %19, %cst_10 [0] : vector<32x128xf32> to vector<128xf32>
    %21 = vector.shape_cast %20 : vector<128xf32> to vector<1x128xf32>
    %22 = vector.extract_strided_slice %2 {offsets = [96, 0], sizes = [32, 128], strides = [1, 1]} : vector<256x128xf32> to vector<32x128xf32>
    %cst_11 = arith.constant dense<0.000000e+00> : vector<128xf32>
    %23 = vector.multi_reduction <add>, %22, %cst_11 [0] : vector<32x128xf32> to vector<128xf32>
    %24 = vector.shape_cast %23 : vector<128xf32> to vector<1x128xf32>
    %25 = arith.mulf %22, %22 : vector<32x128xf32>
    %cst_12 = arith.constant dense<0.000000e+00> : vector<128xf32>
    %26 = vector.multi_reduction <add>, %25, %cst_12 [0] : vector<32x128xf32> to vector<128xf32>
    %27 = vector.shape_cast %26 : vector<128xf32> to vector<1x128xf32>
    %28 = vector.extract_strided_slice %2 {offsets = [128, 0], sizes = [32, 128], strides = [1, 1]} : vector<256x128xf32> to vector<32x128xf32>
    %cst_13 = arith.constant dense<0.000000e+00> : vector<128xf32>
    %29 = vector.multi_reduction <add>, %28, %cst_13 [0] : vector<32x128xf32> to vector<128xf32>
    %30 = vector.shape_cast %29 : vector<128xf32> to vector<1x128xf32>
    %31 = arith.mulf %28, %28 : vector<32x128xf32>
    %cst_14 = arith.constant dense<0.000000e+00> : vector<128xf32>
    %32 = vector.multi_reduction <add>, %31, %cst_14 [0] : vector<32x128xf32> to vector<128xf32>
    %33 = vector.shape_cast %32 : vector<128xf32> to vector<1x128xf32>
    %34 = vector.extract_strided_slice %2 {offsets = [160, 0], sizes = [32, 128], strides = [1, 1]} : vector<256x128xf32> to vector<32x128xf32>
    %cst_15 = arith.constant dense<0.000000e+00> : vector<128xf32>
    %35 = vector.multi_reduction <add>, %34, %cst_15 [0] : vector<32x128xf32> to vector<128xf32>
    %36 = vector.shape_cast %35 : vector<128xf32> to vector<1x128xf32>
    %37 = arith.mulf %34, %34 : vector<32x128xf32>
    %cst_16 = arith.constant dense<0.000000e+00> : vector<128xf32>
    %38 = vector.multi_reduction <add>, %37, %cst_16 [0] : vector<32x128xf32> to vector<128xf32>
    %39 = vector.shape_cast %38 : vector<128xf32> to vector<1x128xf32>
    %40 = vector.extract_strided_slice %2 {offsets = [192, 0], sizes = [32, 128], strides = [1, 1]} : vector<256x128xf32> to vector<32x128xf32>
    %cst_17 = arith.constant dense<0.000000e+00> : vector<128xf32>
    %41 = vector.multi_reduction <add>, %40, %cst_17 [0] : vector<32x128xf32> to vector<128xf32>
    %42 = vector.shape_cast %41 : vector<128xf32> to vector<1x128xf32>
    %43 = arith.mulf %40, %40 : vector<32x128xf32>
    %cst_18 = arith.constant dense<0.000000e+00> : vector<128xf32>
    %44 = vector.multi_reduction <add>, %43, %cst_18 [0] : vector<32x128xf32> to vector<128xf32>
    %45 = vector.shape_cast %44 : vector<128xf32> to vector<1x128xf32>
    %46 = vector.extract_strided_slice %2 {offsets = [224, 0], sizes = [32, 128], strides = [1, 1]} : vector<256x128xf32> to vector<32x128xf32>
    %cst_19 = arith.constant dense<0.000000e+00> : vector<128xf32>
    %47 = vector.multi_reduction <add>, %46, %cst_19 [0] : vector<32x128xf32> to vector<128xf32>
    %48 = vector.shape_cast %47 : vector<128xf32> to vector<1x128xf32>
    %49 = arith.mulf %46, %46 : vector<32x128xf32>
    %cst_20 = arith.constant dense<0.000000e+00> : vector<128xf32>
    %50 = vector.multi_reduction <add>, %49, %cst_20 [0] : vector<32x128xf32> to vector<128xf32>
    %51 = vector.shape_cast %50 : vector<128xf32> to vector<1x128xf32>
    %52 = tpu.concatenate %6, %12, %18, %24, %30, %36, %42, %48 in 0 : vector<1x128xf32>, vector<1x128xf32>, vector<1x128xf32>, vector<1x128xf32>, vector<1x128xf32>, vector<1x128xf32>, vector<1x128xf32>, vector<1x128xf32> -> vector<8x128xf32>
    %c0_21 = arith.constant 0 : index
    %c0_22 = arith.constant 0 : index
    %53 = vector.load %arg4[%c0_21, %c0_22] : memref<8x128xf32, #tpu.memory_space<vmem>>, vector<8x128xf32>
    tpu.vector_store %arg4[%c0_21, %c0_22], %52 {strides = array<i32>} : memref<8x128xf32, #tpu.memory_space<vmem>>, vector<8x128xf32>,
    %54 = tpu.concatenate %9, %15, %21, %27, %33, %39, %45, %51 in 0 : vector<1x128xf32>, vector<1x128xf32>, vector<1x128xf32>, vector<1x128xf32>, vector<1x128xf32>, vector<1x128xf32>, vector<1x128xf32>, vector<1x128xf32> -> vector<8x128xf32>
    %c0_23 = arith.constant 0 : index
    %c0_24 = arith.constant 0 : index
    %55 = vector.load %arg5[%c0_23, %c0_24] : memref<8x128xf32, #tpu.memory_space<vmem>>, vector<8x128xf32>
    tpu.vector_store %arg5[%c0_23, %c0_24], %54 {strides = array<i32>} : memref<8x128xf32, #tpu.memory_space<vmem>>, vector<8x128xf32>,
    return
  }
  func.func @transform_0(%arg0: i32) -> (i32, i32) {
    %c0_i32 = arith.constant 0 : i32
    %c0_i32_0 = arith.constant 0 : i32
    return %arg0, %c0_i32 : i32, i32
  }
  func.func @transform_1(%arg0: i32) -> (i32, i32) {
    %c0_i32 = arith.constant 0 : i32
    %c0_i32_0 = arith.constant 0 : i32
    %c0_i32_1 = arith.constant 0 : i32
    return %c0_i32, %c0_i32_0 : i32, i32
  }
  func.func @transform_2(%arg0: i32) -> (i32, i32) {
    %c0_i32 = arith.constant 0 : i32
    %c0_i32_0 = arith.constant 0 : i32
    return %arg0, %c0_i32 : i32, i32
  }
  func.func @transform_3(%arg0: i32) -> (i32, i32) {
    %c0_i32 = arith.constant 0 : i32
    %c0_i32_0 = arith.constant 0 : i32
    return %arg0, %c0_i32 : i32, i32
  }
  func.func @transform_4(%arg0: i32) -> (i32, i32) {
    %c0_i32 = arith.constant 0 : i32
    %c0_i32_0 = arith.constant 0 : i32
    return %arg0, %c0_i32 : i32, i32
  }
}

</mosaic_0001>

<bundles_post_ra>
// kernel: conv_bn_relu_forward.3
= control target key start
LH: loop header
LB: loop body
LE: loop exit
PB: predicated region body
PF: predicated region fallthrough
CT: control target
= control target key end

     0   :  { %s896_s0 = inlined_call_operand.vmem [shape: f32[512,128], index: 0, kind: input, shape index: {}, may-alias: {0,3}]   ;;  %s897_s1 = inlined_call_operand.vmem [shape: f32[1,128], index: 1, kind: input, shape index: {}]   ;;  %s898_s2 = inlined_call_operand.vmem [shape: f32[1,128], index: 2, kind: input, shape index: {}]   ;;  %s899_s3 = inlined_call_operand.vmem [shape: f32[512,128], index: 3, kind: output, shape index: {}, may-alias: {0,3}]  }
   0x1   :  { %v14_v0 = vld [vmem:[%s896_s0] sm:$0xff]  ;;  %v15_v4 = vld [vmem:[%s896_s0 + $0x8] sm:$0xff]  ;;  %v16_v5 = vld [vmem:[%s896_s0 + $0x10] sm:$0xff] }
   0x2   :  { %v380_v1 = vld [vmem:[%s897_s1] ss:$0 sm:$0xff]  ;;  %v17_v6 = vld [vmem:[%s896_s0 + $0x18] sm:$0xff]  ;;  %v19_v11 = vld [vmem:[%s896_s0 + $0x28] sm:$0xff] }
   0x3   :  { %v385_v2 = vld [vmem:[%s898_s2] ss:$0 sm:$0xff]  ;;  %v85_v3 = vmul.f32 %v380_v1, %v14_v0  ;;  %v86_v7 = vmul.f32 %v380_v1, %v15_v4  ;;  %v87_v8 = vmul.f32 %v380_v1, %v16_v5  ;;  %v88_v9 = vmul.f32 %v380_v1, %v17_v6  ;;  %v20_v12 = vld [vmem:[%s896_s0 + $0x30] sm:$0xff]  ;;  %v21_v17 = vld [vmem:[%s896_s0 + $0x38] sm:$0xff] }
   0x4   :  { %v18_v10 = vld [vmem:[%s896_s0 + $0x20] sm:$0xff]  ;;  %v90_v15 = vmul.f32 %v380_v1, %v19_v11  ;;  %v91_v16 = vmul.f32 %v380_v1, %v20_v12  ;;  %v92_v21 = vmul.f32 %v380_v1, %v21_v17  ;;  %v23_v27 = vld [vmem:[%s896_s0 + $0x48] sm:$0xff]  ;;  %v24_v28 = vld [vmem:[%s896_s0 + $0x50] sm:$0xff] }
   0x5   :  { %v156_v13 = vadd.f32 %v385_v2, %v85_v3  ;;  %v89_v14 = vmul.f32 %v380_v1, %v18_v10  ;;  %v157_v18 = vadd.f32 %v385_v2, %v86_v7  ;;  %v158_v19 = vadd.f32 %v385_v2, %v87_v8  ;;  %v22_v22 = vld [vmem:[%s896_s0 + $0x40] sm:$0xff]  ;;  %v25_v29 = vld [vmem:[%s896_s0 + $0x58] sm:$0xff]  ;;  %v27_v35 = vld [vmem:[%s896_s0 + $0x68] sm:$0xff] }
   0x6   :  { %v159_v20 = vadd.f32 %v385_v2, %v88_v9  ;;  %v161_v25 = vadd.f32 %v385_v2, %v90_v15  ;;  %v162_v26 = vadd.f32 %v385_v2, %v91_v16  ;;  %v163_v33 = vadd.f32 %v385_v2, %v92_v21  ;;  %v26_v34 = vld [vmem:[%s896_s0 + $0x60] sm:$0xff]  ;;  %v28_v36 = vld [vmem:[%s896_s0 + $0x70] sm:$0xff] }
   0x7   :  { %v220_v23 = vmax.f32 %v156_v13, 0.0  ;;  %v160_v24 = vadd.f32 %v385_v2, %v89_v14  ;;  %v221_v30 = vmax.f32 %v157_v18, 0.0  ;;  %v222_v31 = vmax.f32 %v158_v19, 0.0 }
   0x8   :  { %v223_v32 = vmax.f32 %v159_v20, 0.0  ;;  %v225_v38 = vmax.f32 %v161_v25, 0.0  ;;  %v226_v39 = vmax.f32 %v162_v26, 0.0  ;;  %v93_v40 = vmul.f32 %v380_v1, %v22_v22 }
   0x9   :  { %284 = vst [vmem:[%s899_s3] sm:$0xff] %v220_v23  ;;  %v224_v37 = vmax.f32 %v160_v24, 0.0  ;;  %v227_v42 = vmax.f32 %v163_v33, 0.0  ;;  %v94_v43 = vmul.f32 %v380_v1, %v23_v27  ;;  %v95_v44 = vmul.f32 %v380_v1, %v24_v28 }
   0xa   :  { %v96_v45 = vmul.f32 %v380_v1, %v25_v29  ;;  %v164_v46 = vadd.f32 %v385_v2, %v93_v40  ;;  %v97_v47 = vmul.f32 %v380_v1, %v26_v34  ;;  %v98_v48 = vmul.f32 %v380_v1, %v27_v35 }
   0xb   :  { %v99_v49 = vmul.f32 %v380_v1, %v28_v36  ;;  %v165_v50 = vadd.f32 %v385_v2, %v94_v43  ;;  %v166_v51 = vadd.f32 %v385_v2, %v95_v44 }
   0xc   :  { %v167_v52 = vadd.f32 %v385_v2, %v96_v45  ;;  %v228_v55 = vmax.f32 %v164_v46, 0.0  ;;  %v168_v56 = vadd.f32 %v385_v2, %v97_v47  ;;  %v169_v57 = vadd.f32 %v385_v2, %v98_v48 }
   0xd   :  { %v170_v58 = vadd.f32 %v385_v2, %v99_v49  ;;  %v229_v62 = vmax.f32 %v165_v50, 0.0  ;;  %v230_v63 = vmax.f32 %v166_v51, 0.0 }
   0xe   :  { %v231_v0 = vmax.f32 %v167_v52, 0.0  ;;  %v232_v7 = vmax.f32 %v168_v56, 0.0  ;;  %v233_v8 = vmax.f32 %v169_v57, 0.0 }
   0xf   :  { %v234_v9 = vmax.f32 %v170_v58, 0.0 }
  0x10   :  { %v29_v41 = vld [vmem:[%s896_s0 + $0x78] sm:$0xff] }
  0x11   :  { %285 = vst [vmem:[%s899_s3 + $0x8] sm:$0xff] %v221_v30  ;;  %286 = vst [vmem:[%s899_s3 + $0x10] sm:$0xff] %v222_v31  ;;  %v100_v53 = vmul.f32 %v380_v1, %v29_v41 }
  0x12   :  { %287 = vst [vmem:[%s899_s3 + $0x18] sm:$0xff] %v223_v32  ;;  %288 = vst [vmem:[%s899_s3 + $0x20] sm:$0xff] %v224_v37 }
  0x13   :  { %289 = vst [vmem:[%s899_s3 + $0x28] sm:$0xff] %v225_v38  ;;  %290 = vst [vmem:[%s899_s3 + $0x30] sm:$0xff] %v226_v39  ;;  %v171_v3 = vadd.f32 %v385_v2, %v100_v53 }
  0x14   :  { %291 = vst [vmem:[%s899_s3 + $0x38] sm:$0xff] %v227_v42 }
  0x15   :  { %v235_v12 = vmax.f32 %v171_v3, 0.0 }
  0x1b   :  { %v30_v54 = vld [vmem:[%s896_s0 + $0x80] sm:$0xff]  ;;  %v31_v59 = vld [vmem:[%s896_s0 + $0x88] sm:$0xff]  ;;  %v32_v60 = vld [vmem:[%s896_s0 + $0x90] sm:$0xff] }
  0x1c   :  { %v33_v61 = vld [vmem:[%s896_s0 + $0x98] sm:$0xff]  ;;  %v34_v4 = vld [vmem:[%s896_s0 + $0xa0] sm:$0xff]  ;;  %v35_v5 = vld [vmem:[%s896_s0 + $0xa8] sm:$0xff]  ;;  %v101_v10 = vmul.f32 %v380_v1, %v30_v54  ;;  %v102_v13 = vmul.f32 %v380_v1, %v31_v59  ;;  %v103_v14 = vmul.f32 %v380_v1, %v32_v60 }
  0x1d   :  { %v36_v6 = vld [vmem:[%s896_s0 + $0xb0] sm:$0xff]  ;;  %v104_v15 = vmul.f32 %v380_v1, %v33_v61  ;;  %v105_v17 = vmul.f32 %v380_v1, %v34_v4  ;;  %v106_v18 = vmul.f32 %v380_v1, %v35_v5 }
  0x1e   :  { %292 = vst [vmem:[%s899_s3 + $0x40] sm:$0xff] %v228_v55  ;;  %v172_v16 = vadd.f32 %v385_v2, %v101_v10  ;;  %v107_v19 = vmul.f32 %v380_v1, %v36_v6  ;;  %v173_v20 = vadd.f32 %v385_v2, %v102_v13  ;;  %v174_v21 = vadd.f32 %v385_v2, %v103_v14 }
  0x1f   :  { %v175_v22 = vadd.f32 %v385_v2, %v104_v15  ;;  %v176_v26 = vadd.f32 %v385_v2, %v105_v17  ;;  %v177_v27 = vadd.f32 %v385_v2, %v106_v18 }
  0x20   :  { %v236_v25 = vmax.f32 %v172_v16, 0.0  ;;  %v178_v28 = vadd.f32 %v385_v2, %v107_v19  ;;  %v237_v32 = vmax.f32 %v173_v20, 0.0  ;;  %v238_v33 = vmax.f32 %v174_v21, 0.0 }
  0x21   :  { %v239_v34 = vmax.f32 %v175_v22, 0.0  ;;  %v240_v39 = vmax.f32 %v176_v26, 0.0  ;;  %v241_v40 = vmax.f32 %v177_v27, 0.0 }
  0x22   :  { %v242_v41 = vmax.f32 %v178_v28, 0.0 }
  0x25   :  { %v37_v11 = vld [vmem:[%s896_s0 + $0xb8] sm:$0xff] }
  0x26   :  { %293 = vst [vmem:[%s899_s3 + $0x48] sm:$0xff] %v229_v62  ;;  %294 = vst [vmem:[%s899_s3 + $0x50] sm:$0xff] %v230_v63  ;;  %v108_v23 = vmul.f32 %v380_v1, %v37_v11 }
  0x27   :  { %295 = vst [vmem:[%s899_s3 + $0x58] sm:$0xff] %v231_v0  ;;  %296 = vst [vmem:[%s899_s3 + $0x60] sm:$0xff] %v232_v7 }
  0x28   :  { %297 = vst [vmem:[%s899_s3 + $0x68] sm:$0xff] %v233_v8  ;;  %298 = vst [vmem:[%s899_s3 + $0x70] sm:$0xff] %v234_v9  ;;  %v179_v35 = vadd.f32 %v385_v2, %v108_v23 }
  0x29   :  { %299 = vst [vmem:[%s899_s3 + $0x78] sm:$0xff] %v235_v12 }
  0x2a   :  { %v243_v44 = vmax.f32 %v179_v35, 0.0 }
  0x30   :  { %v38_v24 = vld [vmem:[%s896_s0 + $0xc0] sm:$0xff]  ;;  %v39_v29 = vld [vmem:[%s896_s0 + $0xc8] sm:$0xff]  ;;  %v40_v30 = vld [vmem:[%s896_s0 + $0xd0] sm:$0xff] }
  0x31   :  { %v41_v31 = vld [vmem:[%s896_s0 + $0xd8] sm:$0xff]  ;;  %v42_v36 = vld [vmem:[%s896_s0 + $0xe0] sm:$0xff]  ;;  %v43_v37 = vld [vmem:[%s896_s0 + $0xe8] sm:$0xff]  ;;  %v109_v42 = vmul.f32 %v380_v1, %v38_v24  ;;  %v110_v45 = vmul.f32 %v380_v1, %v39_v29  ;;  %v111_v46 = vmul.f32 %v380_v1, %v40_v30 }
  0x32   :  { %v44_v38 = vld [vmem:[%s896_s0 + $0xf0] sm:$0xff]  ;;  %v112_v47 = vmul.f32 %v380_v1, %v41_v31  ;;  %v113_v49 = vmul.f32 %v380_v1, %v42_v36  ;;  %v114_v50 = vmul.f32 %v380_v1, %v43_v37 }
  0x33   :  { %300 = vst [vmem:[%s899_s3 + $0x80] sm:$0xff] %v236_v25  ;;  %v180_v48 = vadd.f32 %v385_v2, %v109_v42  ;;  %v115_v51 = vmul.f32 %v380_v1, %v44_v38  ;;  %v181_v52 = vadd.f32 %v385_v2, %v110_v45  ;;  %v182_v53 = vadd.f32 %v385_v2, %v111_v46 }
  0x34   :  { %v183_v54 = vadd.f32 %v385_v2, %v112_v47  ;;  %v184_v58 = vadd.f32 %v385_v2, %v113_v49  ;;  %v185_v59 = vadd.f32 %v385_v2, %v114_v50 }
  0x35   :  { %v244_v57 = vmax.f32 %v180_v48, 0.0  ;;  %v186_v60 = vadd.f32 %v385_v2, %v115_v51  ;;  %v245_v0 = vmax.f32 %v181_v52, 0.0  ;;  %v246_v3 = vmax.f32 %v182_v53, 0.0 }
  0x36   :  { %v247_v4 = vmax.f32 %v183_v54, 0.0  ;;  %v248_v9 = vmax.f32 %v184_v58, 0.0  ;;  %v249_v10 = vmax.f32 %v185_v59, 0.0 }
  0x37   :  { %v250_v11 = vmax.f32 %v186_v60, 0.0 }
  0x3a   :  { %v45_v43 = vld [vmem:[%s896_s0 + $0xf8] sm:$0xff] }
  0x3b   :  { %301 = vst [vmem:[%s899_s3 + $0x88] sm:$0xff] %v237_v32  ;;  %302 = vst [vmem:[%s899_s3 + $0x90] sm:$0xff] %v238_v33  ;;  %v116_v55 = vmul.f32 %v380_v1, %v45_v43 }
  0x3c   :  { %303 = vst [vmem:[%s899_s3 + $0x98] sm:$0xff] %v239_v34  ;;  %304 = vst [vmem:[%s899_s3 + $0xa0] sm:$0xff] %v240_v39 }
  0x3d   :  { %305 = vst [vmem:[%s899_s3 + $0xa8] sm:$0xff] %v241_v40  ;;  %306 = vst [vmem:[%s899_s3 + $0xb0] sm:$0xff] %v242_v41  ;;  %v187_v5 = vadd.f32 %v385_v2, %v116_v55 }
  0x3e   :  { %307 = vst [vmem:[%s899_s3 + $0xb8] sm:$0xff] %v243_v44 }
  0x3f   :  { %v251_v14 = vmax.f32 %v187_v5, 0.0 }
  0x45   :  { %v46_v56 = vld [vmem:[%s896_s0 + $0x100] sm:$0xff]  ;;  %v47_v61 = vld [vmem:[%s896_s0 + $0x108] sm:$0xff]  ;;  %v48_v62 = vld [vmem:[%s896_s0 + $0x110] sm:$0xff] }
  0x46   :  { %v49_v63 = vld [vmem:[%s896_s0 + $0x118] sm:$0xff]  ;;  %v50_v6 = vld [vmem:[%s896_s0 + $0x120] sm:$0xff]  ;;  %v51_v7 = vld [vmem:[%s896_s0 + $0x128] sm:$0xff]  ;;  %v117_v12 = vmul.f32 %v380_v1, %v46_v56  ;;  %v118_v15 = vmul.f32 %v380_v1, %v47_v61  ;;  %v119_v16 = vmul.f32 %v380_v1, %v48_v62 }
  0x47   :  { %v52_v8 = vld [vmem:[%s896_s0 + $0x130] sm:$0xff]  ;;  %v120_v17 = vmul.f32 %v380_v1, %v49_v63  ;;  %v121_v19 = vmul.f32 %v380_v1, %v50_v6  ;;  %v122_v20 = vmul.f32 %v380_v1, %v51_v7 }
  0x48   :  { %308 = vst [vmem:[%s899_s3 + $0xc0] sm:$0xff] %v244_v57  ;;  %v188_v18 = vadd.f32 %v385_v2, %v117_v12  ;;  %v123_v21 = vmul.f32 %v380_v1, %v52_v8  ;;  %v189_v22 = vadd.f32 %v385_v2, %v118_v15  ;;  %v190_v23 = vadd.f32 %v385_v2, %v119_v16 }
  0x49   :  { %v191_v24 = vadd.f32 %v385_v2, %v120_v17  ;;  %v192_v28 = vadd.f32 %v385_v2, %v121_v19  ;;  %v193_v29 = vadd.f32 %v385_v2, %v122_v20 }
  0x4a   :  { %v252_v27 = vmax.f32 %v188_v18, 0.0  ;;  %v194_v30 = vadd.f32 %v385_v2, %v123_v21  ;;  %v253_v34 = vmax.f32 %v189_v22, 0.0  ;;  %v254_v35 = vmax.f32 %v190_v23, 0.0 }
  0x4b   :  { %v255_v36 = vmax.f32 %v191_v24, 0.0  ;;  %v256_v41 = vmax.f32 %v192_v28, 0.0  ;;  %v257_v42 = vmax.f32 %v193_v29, 0.0 }
  0x4c   :  { %v258_v43 = vmax.f32 %v194_v30, 0.0 }
  0x4f   :  { %v53_v13 = vld [vmem:[%s896_s0 + $0x138] sm:$0xff] }
  0x50   :  { %309 = vst [vmem:[%s899_s3 + $0xc8] sm:$0xff] %v245_v0  ;;  %310 = vst [vmem:[%s899_s3 + $0xd0] sm:$0xff] %v246_v3  ;;  %v124_v25 = vmul.f32 %v380_v1, %v53_v13 }
  0x51   :  { %311 = vst [vmem:[%s899_s3 + $0xd8] sm:$0xff] %v247_v4  ;;  %312 = vst [vmem:[%s899_s3 + $0xe0] sm:$0xff] %v248_v9 }
  0x52   :  { %313 = vst [vmem:[%s899_s3 + $0xe8] sm:$0xff] %v249_v10  ;;  %314 = vst [vmem:[%s899_s3 + $0xf0] sm:$0xff] %v250_v11  ;;  %v195_v37 = vadd.f32 %v385_v2, %v124_v25 }
  0x53   :  { %315 = vst [vmem:[%s899_s3 + $0xf8] sm:$0xff] %v251_v14 }
  0x54   :  { %v259_v46 = vmax.f32 %v195_v37, 0.0 }
  0x5a   :  { %v54_v26 = vld [vmem:[%s896_s0 + $0x140] sm:$0xff]  ;;  %v55_v31 = vld [vmem:[%s896_s0 + $0x148] sm:$0xff]  ;;  %v56_v32 = vld [vmem:[%s896_s0 + $0x150] sm:$0xff] }
  0x5b   :  { %v57_v33 = vld [vmem:[%s896_s0 + $0x158] sm:$0xff]  ;;  %v58_v38 = vld [vmem:[%s896_s0 + $0x160] sm:$0xff]  ;;  %v59_v39 = vld [vmem:[%s896_s0 + $0x168] sm:$0xff]  ;;  %v125_v44 = vmul.f32 %v380_v1, %v54_v26  ;;  %v126_v47 = vmul.f32 %v380_v1, %v55_v31  ;;  %v127_v48 = vmul.f32 %v380_v1, %v56_v32 }
  0x5c   :  { %v60_v40 = vld [vmem:[%s896_s0 + $0x170] sm:$0xff]  ;;  %v128_v49 = vmul.f32 %v380_v1, %v57_v33  ;;  %v129_v51 = vmul.f32 %v380_v1, %v58_v38  ;;  %v130_v52 = vmul.f32 %v380_v1, %v59_v39 }
  0x5d   :  { %316 = vst [vmem:[%s899_s3 + $0x100] sm:$0xff] %v252_v27  ;;  %v196_v50 = vadd.f32 %v385_v2, %v125_v44  ;;  %v131_v53 = vmul.f32 %v380_v1, %v60_v40  ;;  %v197_v54 = vadd.f32 %v385_v2, %v126_v47  ;;  %v198_v55 = vadd.f32 %v385_v2, %v127_v48 }
  0x5e   :  { %v199_v56 = vadd.f32 %v385_v2, %v128_v49  ;;  %v200_v60 = vadd.f32 %v385_v2, %v129_v51  ;;  %v201_v61 = vadd.f32 %v385_v2, %v130_v52 }
  0x5f   :  { %v260_v59 = vmax.f32 %v196_v50, 0.0  ;;  %v202_v62 = vadd.f32 %v385_v2, %v131_v53  ;;  %v261_v4 = vmax.f32 %v197_v54, 0.0  ;;  %v262_v5 = vmax.f32 %v198_v55, 0.0 }
  0x60   :  { %v263_v6 = vmax.f32 %v199_v56, 0.0  ;;  %v264_v11 = vmax.f32 %v200_v60, 0.0  ;;  %v265_v12 = vmax.f32 %v201_v61, 0.0 }
  0x61   :  { %v266_v13 = vmax.f32 %v202_v62, 0.0 }
  0x64   :  { %v61_v45 = vld [vmem:[%s896_s0 + $0x178] sm:$0xff] }
  0x65   :  { %317 = vst [vmem:[%s899_s3 + $0x108] sm:$0xff] %v253_v34  ;;  %318 = vst [vmem:[%s899_s3 + $0x110] sm:$0xff] %v254_v35  ;;  %v132_v57 = vmul.f32 %v380_v1, %v61_v45 }
  0x66   :  { %319 = vst [vmem:[%s899_s3 + $0x118] sm:$0xff] %v255_v36  ;;  %320 = vst [vmem:[%s899_s3 + $0x120] sm:$0xff] %v256_v41 }
  0x67   :  { %321 = vst [vmem:[%s899_s3 + $0x128] sm:$0xff] %v257_v42  ;;  %322 = vst [vmem:[%s899_s3 + $0x130] sm:$0xff] %v258_v43  ;;  %v203_v7 = vadd.f32 %v385_v2, %v132_v57 }
  0x68   :  { %323 = vst [vmem:[%s899_s3 + $0x138] sm:$0xff] %v259_v46 }
  0x69   :  { %v267_v16 = vmax.f32 %v203_v7, 0.0 }
  0x6f   :  { %v62_v58 = vld [vmem:[%s896_s0 + $0x180] sm:$0xff]  ;;  %v63_v63 = vld [vmem:[%s896_s0 + $0x188] sm:$0xff]  ;;  %v64_v0 = vld [vmem:[%s896_s0 + $0x190] sm:$0xff] }
  0x70   :  { %v65_v3 = vld [vmem:[%s896_s0 + $0x198] sm:$0xff]  ;;  %v66_v8 = vld [vmem:[%s896_s0 + $0x1a0] sm:$0xff]  ;;  %v67_v9 = vld [vmem:[%s896_s0 + $0x1a8] sm:$0xff]  ;;  %v133_v14 = vmul.f32 %v380_v1, %v62_v58  ;;  %v134_v17 = vmul.f32 %v380_v1, %v63_v63  ;;  %v135_v18 = vmul.f32 %v380_v1, %v64_v0 }
  0x71   :  { %v68_v10 = vld [vmem:[%s896_s0 + $0x1b0] sm:$0xff]  ;;  %v136_v19 = vmul.f32 %v380_v1, %v65_v3  ;;  %v137_v21 = vmul.f32 %v380_v1, %v66_v8  ;;  %v138_v22 = vmul.f32 %v380_v1, %v67_v9 }
  0x72   :  { %324 = vst [vmem:[%s899_s3 + $0x140] sm:$0xff] %v260_v59  ;;  %v204_v20 = vadd.f32 %v385_v2, %v133_v14  ;;  %v139_v23 = vmul.f32 %v380_v1, %v68_v10  ;;  %v205_v24 = vadd.f32 %v385_v2, %v134_v17  ;;  %v206_v25 = vadd.f32 %v385_v2, %v135_v18 }
  0x73   :  { %v207_v26 = vadd.f32 %v385_v2, %v136_v19  ;;  %v208_v30 = vadd.f32 %v385_v2, %v137_v21  ;;  %v209_v31 = vadd.f32 %v385_v2, %v138_v22 }
  0x74   :  { %v268_v29 = vmax.f32 %v204_v20, 0.0  ;;  %v210_v32 = vadd.f32 %v385_v2, %v139_v23  ;;  %v269_v36 = vmax.f32 %v205_v24, 0.0  ;;  %v270_v37 = vmax.f32 %v206_v25, 0.0 }
  0x75   :  { %v271_v38 = vmax.f32 %v207_v26, 0.0  ;;  %v272_v43 = vmax.f32 %v208_v30, 0.0  ;;  %v273_v44 = vmax.f32 %v209_v31, 0.0 }
  0x76   :  { %v274_v45 = vmax.f32 %v210_v32, 0.0 }
  0x79   :  { %v69_v15 = vld [vmem:[%s896_s0 + $0x1b8] sm:$0xff] }
  0x7a   :  { %325 = vst [vmem:[%s899_s3 + $0x148] sm:$0xff] %v261_v4  ;;  %326 = vst [vmem:[%s899_s3 + $0x150] sm:$0xff] %v262_v5  ;;  %v140_v27 = vmul.f32 %v380_v1, %v69_v15 }
  0x7b   :  { %327 = vst [vmem:[%s899_s3 + $0x158] sm:$0xff] %v263_v6  ;;  %328 = vst [vmem:[%s899_s3 + $0x160] sm:$0xff] %v264_v11 }
  0x7c   :  { %329 = vst [vmem:[%s899_s3 + $0x168] sm:$0xff] %v265_v12  ;;  %330 = vst [vmem:[%s899_s3 + $0x170] sm:$0xff] %v266_v13  ;;  %v211_v39 = vadd.f32 %v385_v2, %v140_v27 }
  0x7d   :  { %331 = vst [vmem:[%s899_s3 + $0x178] sm:$0xff] %v267_v16 }
  0x7e   :  { %v275_v48 = vmax.f32 %v211_v39, 0.0 }
  0x84   :  { %v70_v28 = vld [vmem:[%s896_s0 + $0x1c0] sm:$0xff]  ;;  %v71_v33 = vld [vmem:[%s896_s0 + $0x1c8] sm:$0xff]  ;;  %v72_v34 = vld [vmem:[%s896_s0 + $0x1d0] sm:$0xff] }
  0x85   :  { %v73_v35 = vld [vmem:[%s896_s0 + $0x1d8] sm:$0xff]  ;;  %v74_v40 = vld [vmem:[%s896_s0 + $0x1e0] sm:$0xff]  ;;  %v75_v41 = vld [vmem:[%s896_s0 + $0x1e8] sm:$0xff]  ;;  %v141_v46 = vmul.f32 %v380_v1, %v70_v28  ;;  %v142_v49 = vmul.f32 %v380_v1, %v71_v33  ;;  %v143_v50 = vmul.f32 %v380_v1, %v72_v34 }
  0x86   :  { %v76_v42 = vld [vmem:[%s896_s0 + $0x1f0] sm:$0xff]  ;;  %v144_v51 = vmul.f32 %v380_v1, %v73_v35  ;;  %v145_v53 = vmul.f32 %v380_v1, %v74_v40  ;;  %v146_v54 = vmul.f32 %v380_v1, %v75_v41 }
  0x87   :  { %332 = vst [vmem:[%s899_s3 + $0x180] sm:$0xff] %v268_v29  ;;  %v212_v52 = vadd.f32 %v385_v2, %v141_v46  ;;  %v147_v55 = vmul.f32 %v380_v1, %v76_v42  ;;  %v213_v56 = vadd.f32 %v385_v2, %v142_v49  ;;  %v214_v57 = vadd.f32 %v385_v2, %v143_v50 }
  0x88   :  { %v215_v58 = vadd.f32 %v385_v2, %v144_v51  ;;  %v216_v61 = vadd.f32 %v385_v2, %v145_v53  ;;  %v217_v62 = vadd.f32 %v385_v2, %v146_v54 }
  0x89   :  { %v276_v60 = vmax.f32 %v212_v52, 0.0  ;;  %v218_v63 = vadd.f32 %v385_v2, %v147_v55  ;;  %v277_v0 = vmax.f32 %v213_v56, 0.0  ;;  %v278_v3 = vmax.f32 %v214_v57, 0.0 }
  0x8a   :  { %v279_v4 = vmax.f32 %v215_v58, 0.0  ;;  %v280_v6 = vmax.f32 %v216_v61, 0.0  ;;  %v281_v7 = vmax.f32 %v217_v62, 0.0 }
  0x8b   :  { %v282_v8 = vmax.f32 %v218_v63, 0.0 }
  0x8e   :  { %v77_v47 = vld [vmem:[%s896_s0 + $0x1f8] sm:$0xff] }
  0x8f   :  { %333 = vst [vmem:[%s899_s3 + $0x188] sm:$0xff] %v269_v36  ;;  %334 = vst [vmem:[%s899_s3 + $0x190] sm:$0xff] %v270_v37  ;;  %v148_v59 = vmul.f32 %v380_v1, %v77_v47 }
  0x90   :  { %335 = vst [vmem:[%s899_s3 + $0x198] sm:$0xff] %v271_v38  ;;  %336 = vst [vmem:[%s899_s3 + $0x1a0] sm:$0xff] %v272_v43 }
  0x91   :  { %337 = vst [vmem:[%s899_s3 + $0x1a8] sm:$0xff] %v273_v44  ;;  %338 = vst [vmem:[%s899_s3 + $0x1b0] sm:$0xff] %v274_v45  ;;  %v219_v5 = vadd.f32 %v385_v2, %v148_v59 }
  0x92   :  { %339 = vst [vmem:[%s899_s3 + $0x1b8] sm:$0xff] %v275_v48  ;;  %340 = vst [vmem:[%s899_s3 + $0x1c0] sm:$0xff] %v276_v60 }
  0x93   :  { %341 = vst [vmem:[%s899_s3 + $0x1c8] sm:$0xff] %v277_v0  ;;  %342 = vst [vmem:[%s899_s3 + $0x1d0] sm:$0xff] %v278_v3  ;;  %v283_v1 = vmax.f32 %v219_v5, 0.0 }
  0x94   :  { %343 = vst [vmem:[%s899_s3 + $0x1d8] sm:$0xff] %v279_v4  ;;  %344 = vst [vmem:[%s899_s3 + $0x1e0] sm:$0xff] %v280_v6 }
  0x95   :  { %345 = vst [vmem:[%s899_s3 + $0x1e8] sm:$0xff] %v281_v7  ;;  %346 = vst [vmem:[%s899_s3 + $0x1f0] sm:$0xff] %v282_v8 }
  0x96   :  { %347 = vst [vmem:[%s899_s3 + $0x1f8] sm:$0xff] %v283_v1 }

// kernel: conv_bn_relu_forward.2
= control target key start
LH: loop header
LB: loop body
LE: loop exit
PB: predicated region body
PF: predicated region fallthrough
CT: control target
= control target key end

     0   :  { %s1129_s15 = smov 0   ;;  %s1324_s0 = inlined_call_operand.vmem [shape: f32[512,36], index: 0, kind: input, shape index: {}]   ;;  %s1325_s1 = inlined_call_operand.vmem [shape: f32[36,128], index: 1, kind: input, shape index: {}]   ;;  %s1326_s2 = inlined_call_operand.vmem [shape: f32[512,128], index: 2, kind: output, shape index: {0}]   ;;  %s1327_s3 = inlined_call_operand.vmem [shape: f32[16,128], index: 3, kind: output, shape index: {1}]   ;;  %s1328_s4 = inlined_call_operand.vmem [shape: f32[16,128], index: 4, kind: output, shape index: {2}]  }
   0x1 LB: > { %s1135_s16 = sadd.s32 4294967295, %s1102_s15   ;;  %p937_p0 = scmp.ge.s32.totalorder %s1102_s15, 1  ;;  %s1102_s15 = sphi %s1129_s15, %s15_s15  }
   0x2   : > { %p168_p1 = scmp.lt.s32.totalorder %s1102_s15, 3 }
   0x4   : > { %p169_p2 = pnand %p937_p0, %p168_p1 }
   0x5   : > { %v254_v0 = vld [vmem:[%s1325_s1] sm:$0xff] (!%p169_p2)  ;;  %v255_v1 = vld [vmem:[%s1325_s1 + $0x8] sm:$0xff] (!%p169_p2)  ;;  %v256_v2 = vld [vmem:[%s1325_s1 + $0x10] sm:$0xff] (!%p169_p2)  ;;  %s938_s23 = sshll.u32 (!%p169_p2), %s1135_s16, 5  ;;  %vm356_vm0 = vcmask (!%p169_p2), 1043456   ;;  %vm259_vm1 = vcmask (!%p169_p2), 293888  }
   0x6   : > { %172 = sbr.rel (%p169_p2) target bundleno = 287 (0x11f), region = 28  ;;  %v1074_v3 = vpack.c.bf16 (!%p169_p2), %v255_v1, %v254_v0  ;;  %v257_v4 = vld [vmem:[%s1325_s1 + $0x18] sm:$0xff] (!%p169_p2)  ;;  %p203_p3 = scmp.lt.s32.totalorder (!%p169_p2), %s938_s23, 63  ;;  %v258_v6 = vld [vmem:[%s1325_s1 + $0x20] sm:$0xf] (!%p169_p2)  ;;  %vm793_vm2 = vcmask (!%p169_p2), 1040384  }
   0x7   : > { %v1078_v5 = vpack.c.bf16 (!%p169_p2), %v257_v4, %v256_v2  ;;  %vm795_vm3 = vcmask (!%p169_p2), 1041408   ;;  %p214_p4 = scmp.lt.s32.totalorder (!%p169_p2), %s1135_s16, 1  ;;  %vm797_vm4 = vcmask (!%p169_p2), 1042432   ;;  %vm800_vm5 = vcmask (!%p169_p2), 1044480  }
   0x8   : > { %1075 = vmatprep.subr.bf16.mxu0 (!%p169_p2), %v1074_v3  ;;  %1082 = vmatprep.subr.bf16.mxu1 (!%p169_p2), %v1074_v3  ;;  %vm802_vm6 = vcmask (!%p169_p2), 1045504   ;;  %vm804_vm7 = vcmask (!%p169_p2), 1046528  }
   0x9   : > { %1077 = vmatpush3.bf16.msra.mxu0 (!%p169_p2), %v1074_v3  ;;  %1085 = vmatpush3.bf16.msra.mxu1 (!%p169_p2), %v1074_v3 }
   0xa   : > { %1079 = vmatprep.subr.bf16.mxu0 (!%p169_p2), %v1078_v5  ;;  %1083 = vmatprep.subr.bf16.mxu1 (!%p169_p2), %v1078_v5 }
   0xd   : > { %s1330_s23 = smov (!%p203_p3, %s938_s23), 63  ;;  %1081 = vmatpush3.bf16.msra.mxu0 %v1078_v5  ;;  %1086 = vmatpush3.bf16.msra.mxu1 %v1078_v5  ;;  %s1332_s16 = smov (!%p214_p4, %s1135_s16), 1 }
   0xe   : > { %s939_s26 = sshll.u32 %s1330_s23, 3  ;;  %1024 = vmatprep.subr.msk.mxu0 %vm356_vm0, %v258_v6  ;;  %1084 = vmatprep.subr.msk.mxu1 %vm356_vm0, %v258_v6  ;;  %s942_s9 = sshll.u32 %s1332_s16, 3 }
   0xf   : > { %s1163_s5 = scalar_lea.vmem %s1324_s0, %s939_s26  ;;  %s1238_s8 = scalar_lea.vmem %s1326_s2, %s939_s26 }
  0x10   : > { %v222_v7 = vld [vmem:[%s1163_s5] sm:$0xff]  ;;  %v223_v9 = vld [vmem:[%s1163_s5 + $0x8] sm:$0xff]  ;;  %v224_v11 = vld [vmem:[%s1163_s5 + $0x10] sm:$0xff]  ;;  %s217_s12 = scalar_lea.vmem %s1327_s3, %s942_s9  ;;  %s221_s16 = scalar_lea.vmem %s1328_s4, %s942_s9 }
  0x11   : > { %v238_v8 = vld [vmem:[%s1163_s5 + $0x80] sm:$0xff]  ;;  %1026 = vmatprep.mubr.msk.f32.mxu0 %vm259_vm1, %v222_v7  ;;  %v239_v10 = vld [vmem:[%s1163_s5 + $0x88] sm:$0xff]  ;;  %v240_v12 = vld [vmem:[%s1163_s5 + $0x90] sm:$0xff]  ;;  %1025 = vmatpush3.msk.msra.mxu0 %vm356_vm0, %v258_v6 }
  0x12   : > { %1050 = vmatprep.mubr.msk.f32.mxu1 %vm259_vm1, %v238_v8  ;;  %1087 = vmatpush3.msk.msra.mxu1 %vm356_vm0, %v258_v6  ;;  %v225_v13 = vld [vmem:[%s1163_s5 + $0x18] sm:$0xff]  ;;  %v226_v15 = vld [vmem:[%s1163_s5 + $0x20] sm:$0xff]  ;;  %v227_v17 = vld [vmem:[%s1163_s5 + $0x28] sm:$0xff] }
  0x13   : > { %1027 = vmatmul.mubr.msk.f32.vlgmr.msra.gmra.mrb[0].mxu0 %vm259_vm1, %v223_v9  ;;  %1051 = vmatmul.mubr.msk.f32.vlgmr.msra.gmra.mrb[0].mxu1 %vm259_vm1, %v239_v10  ;;  %v241_v14 = vld [vmem:[%s1163_s5 + $0x98] sm:$0xff]  ;;  %v242_v16 = vld [vmem:[%s1163_s5 + $0xa0] sm:$0xff]  ;;  %v243_v18 = vld [vmem:[%s1163_s5 + $0xa8] sm:$0xff] }
  0x14   : > { %1029 = vmatprep.mubr.msk.f32.mxu0 %vm259_vm1, %v224_v11  ;;  %1053 = vmatprep.mubr.msk.f32.mxu1 %vm259_vm1, %v240_v12  ;;  %v228_v19 = vld [vmem:[%s1163_s5 + $0x30] sm:$0xff]  ;;  %v229_v21 = vld [vmem:[%s1163_s5 + $0x38] sm:$0xff]  ;;  %v230_v23 = vld [vmem:[%s1163_s5 + $0x40] sm:$0xff] }
  0x15   : > { %v244_v20 = vld [vmem:[%s1163_s5 + $0xb0] sm:$0xff]  ;;  %v245_v22 = vld [vmem:[%s1163_s5 + $0xb8] sm:$0xff]  ;;  %v246_v24 = vld [vmem:[%s1163_s5 + $0xc0] sm:$0xff] }
  0x16   : > { %v231_v25 = vld [vmem:[%s1163_s5 + $0x48] sm:$0xff]  ;;  %v232_v27 = vld [vmem:[%s1163_s5 + $0x50] sm:$0xff]  ;;  %v233_v29 = vld [vmem:[%s1163_s5 + $0x58] sm:$0xff] }
  0x17   : > { %1030 = vmatmul.mubr.msk.f32.gmra.mrb[2].mxu0 %vm259_vm1, %v225_v13  ;;  %1054 = vmatmul.mubr.msk.f32.gmra.mrb[2].mxu1 %vm259_vm1, %v241_v14  ;;  %v247_v26 = vld [vmem:[%s1163_s5 + $0xc8] sm:$0xff]  ;;  %v248_v28 = vld [vmem:[%s1163_s5 + $0xd0] sm:$0xff]  ;;  %v249_v30 = vld [vmem:[%s1163_s5 + $0xd8] sm:$0xff] }
  0x18   : > { %1032 = vmatprep.mubr.msk.f32.mxu0 %vm259_vm1, %v226_v15  ;;  %1056 = vmatprep.mubr.msk.f32.mxu1 %vm259_vm1, %v242_v16  ;;  %v234_v31 = vld [vmem:[%s1163_s5 + $0x60] sm:$0xff]  ;;  %v235_v33 = vld [vmem:[%s1163_s5 + $0x68] sm:$0xff]  ;;  %v236_v35 = vld [vmem:[%s1163_s5 + $0x70] sm:$0xff] }
  0x19   : > { %v250_v32 = vld [vmem:[%s1163_s5 + $0xe0] sm:$0xff]  ;;  %v251_v34 = vld [vmem:[%s1163_s5 + $0xe8] sm:$0xff]  ;;  %v252_v36 = vld [vmem:[%s1163_s5 + $0xf0] sm:$0xff] }
  0x1a   : > { %v237_v37 = vld [vmem:[%s1163_s5 + $0x78] sm:$0xff] }
  0x1b   : > { %1033 = vmatmul.mubr.msk.f32.gmra.mrb[4].mxu0 %vm259_vm1, %v227_v17  ;;  %1057 = vmatmul.mubr.msk.f32.gmra.mrb[4].mxu1 %vm259_vm1, %v243_v18  ;;  %v253_v38 = vld [vmem:[%s1163_s5 + $0xf8] sm:$0xff] }
  0x1c   : > { %1035 = vmatprep.mubr.msk.f32.mxu0 %vm259_vm1, %v228_v19  ;;  %1059 = vmatprep.mubr.msk.f32.mxu1 %vm259_vm1, %v244_v20 }
  0x1f   : > { %1036 = vmatmul.mubr.msk.f32.gmra.mrb[6].mxu0 %vm259_vm1, %v229_v21  ;;  %1060 = vmatmul.mubr.msk.f32.gmra.mrb[6].mxu1 %vm259_vm1, %v245_v22 }
  0x20   : > { %1038 = vmatprep.mubr.msk.f32.mxu0 %vm259_vm1, %v230_v23  ;;  %1062 = vmatprep.mubr.msk.f32.mxu1 %vm259_vm1, %v246_v24 }
  0x23   : > { %1039 = vmatmul.mubr.msk.f32.gmra.mrb[8].mxu0 %vm259_vm1, %v231_v25  ;;  %1063 = vmatmul.mubr.msk.f32.gmra.mrb[8].mxu1 %vm259_vm1, %v247_v26 }
  0x24   : > { %1041 = vmatprep.mubr.msk.f32.mxu0 %vm259_vm1, %v232_v27  ;;  %1065 = vmatprep.mubr.msk.f32.mxu1 %vm259_vm1, %v248_v28 }
  0x27   : > { %1042 = vmatmul.mubr.msk.f32.gmra.mrb[10].mxu0 %vm259_vm1, %v233_v29  ;;  %1066 = vmatmul.mubr.msk.f32.gmra.mrb[10].mxu1 %vm259_vm1, %v249_v30 }
  0x28   : > { %1044 = vmatprep.mubr.msk.f32.mxu0 %vm259_vm1, %v234_v31  ;;  %1068 = vmatprep.mubr.msk.f32.mxu1 %vm259_vm1, %v250_v32 }
  0x2b   : > { %1045 = vmatmul.mubr.msk.f32.gmra.mrb[12].mxu0 %vm259_vm1, %v235_v33  ;;  %1069 = vmatmul.mubr.msk.f32.gmra.mrb[12].mxu1 %vm259_vm1, %v251_v34 }
  0x2c   : > { %1047 = vmatprep.mubr.msk.f32.mxu0 %vm259_vm1, %v236_v35  ;;  %1071 = vmatprep.mubr.msk.f32.mxu1 %vm259_vm1, %v252_v36 }
  0x2f   : > { %1048 = vmatmul.mubr.msk.f32.gmra.mrb[14].mxu0 %vm259_vm1, %v237_v37  ;;  %1072 = vmatmul.mubr.msk.f32.gmra.mrb[14].mxu1 %vm259_vm1, %v253_v38 }
  0xe6   : > { %v1028_v39 = vpop.f32.mrb[0].mxu0  ;;  %v1052_v40 = vpop.f32.mrb[0].mxu1 }
  0xe7   : > { %586 = vst [vmem:[%s1238_s8 + $0x8] sm:$0xff] %v1028_v39  ;;  %v627_v41 = vmul.f32 %v1028_v39, %v1028_v39  ;;  %v426_v42 = vpop.f32.mrb[1].mxu0  ;;  %602 = vst [vmem:[%s1238_s8 + $0x88] sm:$0xff] %v1052_v40  ;;  %v715_v43 = vmul.f32 %v1052_v40, %v1052_v40  ;;  %v506_v44 = vpop.f32.mrb[1].mxu1 }
  0xe8   : > { %585 = vst [vmem:[%s1238_s8] sm:$0xff] %v426_v42  ;;  %v617_v45 = vadd.f32 %v1028_v39, %v426_v42  ;;  %v626_v46 = vmul.f32 %v426_v42, %v426_v42  ;;  %601 = vst [vmem:[%s1238_s8 + $0x80] sm:$0xff] %v506_v44  ;;  %v705_v47 = vadd.f32 %v1052_v40, %v506_v44 }
  0xe9   : > { %v714_v48 = vmul.f32 %v506_v44, %v506_v44 }
  0xea   : > { %v630_v49 = vadd.f32 %v627_v41, %v626_v46  ;;  %v1031_v51 = vpop.f32.mrb[2].mxu0  ;;  %v1055_v52 = vpop.f32.mrb[2].mxu1 }
  0xeb   : > { %v718_v50 = vadd.f32 %v715_v43, %v714_v48  ;;  %588 = vst [vmem:[%s1238_s8 + $0x18] sm:$0xff] %v1031_v51  ;;  %604 = vst [vmem:[%s1238_s8 + $0x98] sm:$0xff] %v1055_v52  ;;  %v717_v53 = vmul.f32 %v1055_v52, %v1055_v52  ;;  %v436_v54 = vpop.f32.mrb[3].mxu0  ;;  %v516_v55 = vpop.f32.mrb[3].mxu1  ;;  %v629_v60 = vmul.f32 %v1031_v51, %v1031_v51 }
  0xec   : > { %587 = vst [vmem:[%s1238_s8 + $0x10] sm:$0xff] %v436_v54  ;;  %v618_v56 = vadd.f32 %v617_v45, %v436_v54  ;;  %v628_v57 = vmul.f32 %v436_v54, %v436_v54  ;;  %603 = vst [vmem:[%s1238_s8 + $0x90] sm:$0xff] %v516_v55  ;;  %v706_v58 = vadd.f32 %v705_v47, %v516_v55 }
  0xed   : > { %v716_v59 = vmul.f32 %v516_v55, %v516_v55 }
  0xee   : > { %v619_v61 = vadd.f32 %v1031_v51, %v618_v56  ;;  %v631_v62 = vadd.f32 %v630_v49, %v628_v57  ;;  %v707_v63 = vadd.f32 %v1055_v52, %v706_v58  ;;  %v1034_v1 = vpop.f32.mrb[4].mxu0  ;;  %v1058_v2 = vpop.f32.mrb[4].mxu1 }
  0xef   : > { %v719_v0 = vadd.f32 %v718_v50, %v716_v59  ;;  %590 = vst [vmem:[%s1238_s8 + $0x28] sm:$0xff] %v1034_v1  ;;  %v649_v3 = vmul.f32 %v1034_v1, %v1034_v1  ;;  %v446_v4 = vpop.f32.mrb[5].mxu0  ;;  %606 = vst [vmem:[%s1238_s8 + $0xa8] sm:$0xff] %v1058_v2  ;;  %v737_v5 = vmul.f32 %v1058_v2, %v1058_v2  ;;  %v526_v6 = vpop.f32.mrb[5].mxu1 }
  0xf0   : > { %v620_v7 = vrot.slane %v619_v61, 4  ;;  %v632_v8 = vadd.f32 %v631_v62, %v629_v60  ;;  %589 = vst [vmem:[%s1238_s8 + $0x20] sm:$0xff] %v446_v4  ;;  %605 = vst [vmem:[%s1238_s8 + $0xa0] sm:$0xff] %v526_v6  ;;  %v639_v10 = vadd.f32 %v1034_v1, %v446_v4  ;;  %v648_v11 = vmul.f32 %v446_v4, %v446_v4 }
  0xf1   : > { %v1250_v9 = vadd.f32 %v719_v0, %v717_v53  ;;  %v727_v12 = vadd.f32 %v1058_v2, %v526_v6  ;;  %v736_v13 = vmul.f32 %v526_v6, %v526_v6  ;;  %v708_v29 = vrot.slane %v707_v63, 4 }
  0xf2   : > { %v621_v14 = vadd.f32 %v620_v7, %v619_v61  ;;  %v633_v15 = vrot.slane %v632_v8, 4  ;;  %v1037_v16 = vpop.f32.mrb[6].mxu0  ;;  %v1061_v17 = vpop.f32.mrb[6].mxu1  ;;  %v652_v18 = vadd.f32 %v649_v3, %v648_v11 }
  0xf3   : > { %v740_v19 = vadd.f32 %v737_v5, %v736_v13  ;;  %592 = vst [vmem:[%s1238_s8 + $0x38] sm:$0xff] %v1037_v16  ;;  %608 = vst [vmem:[%s1238_s8 + $0xb8] sm:$0xff] %v1061_v17  ;;  %v456_v20 = vpop.f32.mrb[7].mxu0  ;;  %v536_v21 = vpop.f32.mrb[7].mxu1  ;;  %v739_v24 = vmul.f32 %v1061_v17, %v1061_v17  ;;  %v651_v30 = vmul.f32 %v1037_v16, %v1037_v16  ;;  %v721_v47 = vrot.slane %v1250_v9, 4 }
  0xf4   : > { %v622_v22 = vrot.slane %v621_v14, 2  ;;  %v634_v23 = vadd.f32 %v633_v15, %v632_v8  ;;  %591 = vst [vmem:[%s1238_s8 + $0x30] sm:$0xff] %v456_v20  ;;  %607 = vst [vmem:[%s1238_s8 + $0xb0] sm:$0xff] %v536_v21  ;;  %v640_v25 = vadd.f32 %v639_v10, %v456_v20  ;;  %v650_v26 = vmul.f32 %v456_v20, %v456_v20 }
  0xf5   : > { %v728_v27 = vadd.f32 %v727_v12, %v536_v21  ;;  %v738_v28 = vmul.f32 %v536_v21, %v536_v21  ;;  %v1266_v46 = vadd.f32 %v708_v29, %v707_v63  ;;  %v1275_v1 = vadd.f32 %v721_v47, %v1250_v9 }
  0xf6   : > { %v1040_v31 = vpop.f32.mrb[8].mxu0  ;;  %v1064_v32 = vpop.f32.mrb[8].mxu1  ;;  %v641_v33 = vadd.f32 %v1037_v16, %v640_v25  ;;  %v653_v34 = vadd.f32 %v652_v18, %v650_v26  ;;  %v623_v39 = vadd.f32 %v622_v22, %v621_v14  ;;  %v635_v40 = vrot.slane %v634_v23, 2 }
  0xf7   : > { %v1258_v35 = vadd.f32 %v1061_v17, %v728_v27  ;;  %v741_v36 = vadd.f32 %v740_v19, %v738_v28  ;;  %594 = vst [vmem:[%s1238_s8 + $0x48] sm:$0xff] %v1040_v31  ;;  %v466_v37 = vpop.f32.mrb[9].mxu0  ;;  %610 = vst [vmem:[%s1238_s8 + $0xc8] sm:$0xff] %v1064_v32  ;;  %v546_v38 = vpop.f32.mrb[9].mxu1  ;;  %v671_v53 = vmul.f32 %v1040_v31, %v1040_v31  ;;  %v710_v0 = vrot.slane %v1266_v46, 2 }
  0xf8   : > { %593 = vst [vmem:[%s1238_s8 + $0x40] sm:$0xff] %v466_v37  ;;  %609 = vst [vmem:[%s1238_s8 + $0xc0] sm:$0xff] %v546_v38  ;;  %v642_v41 = vrot.slane %v641_v33, 4  ;;  %v654_v42 = vadd.f32 %v653_v34, %v651_v30  ;;  %v624_v52 = vrot.slane %v623_v39, 1  ;;  %v661_v54 = vadd.f32 %v1040_v31, %v466_v37 }
  0xf9   : > { %v1264_v43 = vadd.f32 %v741_v36, %v739_v24  ;;  %v636_v55 = vadd.f32 %v635_v40, %v634_v23  ;;  %v670_v58 = vmul.f32 %v466_v37, %v466_v37  ;;  %v759_v59 = vmul.f32 %v1064_v32, %v1064_v32 }
  0xfa   : > { %v1043_v44 = vpop.f32.mrb[10].mxu0  ;;  %v1067_v45 = vpop.f32.mrb[10].mxu1  ;;  %v643_v48 = vadd.f32 %v642_v41, %v641_v33  ;;  %v655_v49 = vrot.slane %v654_v42, 4  ;;  %v749_v60 = vadd.f32 %v1064_v32, %v546_v38  ;;  %v758_v61 = vmul.f32 %v546_v38, %v546_v38 }
  0xfb   : > { %596 = vst [vmem:[%s1238_s8 + $0x58] sm:$0xff] %v1043_v44  ;;  %612 = vst [vmem:[%s1238_s8 + $0xd8] sm:$0xff] %v1067_v45  ;;  %v476_v50 = vpop.f32.mrb[11].mxu0  ;;  %v556_v51 = vpop.f32.mrb[11].mxu1  ;;  %v625_v6 = vadd.f32 %v624_v52, %v623_v39  ;;  %v730_v7 = vrot.slane %v1258_v35, 4  ;;  %v674_v8 = vadd.f32 %v671_v53, %v670_v58  ;;  %v637_v11 = vrot.slane %v636_v55, 1 }
  0xfc   : > { %595 = vst [vmem:[%s1238_s8 + $0x50] sm:$0xff] %v476_v50  ;;  %611 = vst [vmem:[%s1238_s8 + $0xd0] sm:$0xff] %v556_v51  ;;  %v644_v56 = vrot.slane %v643_v48, 2  ;;  %v656_v57 = vadd.f32 %v655_v49, %v654_v42  ;;  %v762_v10 = vadd.f32 %v759_v59, %v758_v61  ;;  %v761_v9 = vmul.f32 %v1067_v45, %v1067_v45 }
  0xfd   : > { %v662_v14 = vadd.f32 %v661_v54, %v476_v50  ;;  %v672_v15 = vmul.f32 %v476_v50, %v476_v50  ;;  %v750_v16 = vadd.f32 %v749_v60, %v556_v51  ;;  %v760_v17 = vmul.f32 %v556_v51, %v556_v51 }
  0xfe   : > { %v1046_v62 = vpop.f32.mrb[12].mxu0  ;;  %v1070_v63 = vpop.f32.mrb[12].mxu1  ;;  %v645_v2 = vadd.f32 %v644_v56, %v643_v48  ;;  %v657_v3 = vrot.slane %v656_v57, 2  ;;  %v743_v22 = vrot.slane %v1264_v43, 4  ;;  %v673_v23 = vmul.f32 %v1043_v44, %v1043_v44 }
  0xff   : > { %598 = vst [vmem:[%s1238_s8 + $0x68] sm:$0xff] %v1046_v62  ;;  %v486_v4 = vpop.f32.mrb[13].mxu0  ;;  %614 = vst [vmem:[%s1238_s8 + $0xe8] sm:$0xff] %v1070_v63  ;;  %v566_v5 = vpop.f32.mrb[13].mxu1  ;;  %v663_v26 = vadd.f32 %v1043_v44, %v662_v14  ;;  %v675_v27 = vadd.f32 %v674_v8, %v672_v15  ;;  %v751_v28 = vadd.f32 %v1067_v45, %v750_v16  ;;  %v723_v45 = vrot.slane %v1275_v1, 2 }
 0x100   : > { %597 = vst [vmem:[%s1238_s8 + $0x60] sm:$0xff] %v486_v4  ;;  %613 = vst [vmem:[%s1238_s8 + $0xe0] sm:$0xff] %v566_v5  ;;  %v646_v12 = vrot.slane %v645_v2, 1  ;;  %v658_v13 = vadd.f32 %v657_v3, %v656_v57  ;;  %v763_v29 = vadd.f32 %v762_v10, %v760_v17  ;;  %v638_v30 = vadd.f32 %v637_v11, %v636_v55 }
 0x101   : > { %v693_v33 = vmul.f32 %v1046_v62, %v1046_v62  ;;  %v664_v34 = vrot.slane %v663_v26, 4  ;;  %v676_v36 = vadd.f32 %v675_v27, %v673_v23  ;;  %v752_v37 = vrot.slane %v751_v28, 4 }
 0x102   : > { %v1049_v18 = vpop.f32.mrb[14].mxu0  ;;  %v1073_v19 = vpop.f32.mrb[14].mxu1  ;;  %v647_v20 = vadd.f32 %v646_v12, %v645_v2  ;;  %v659_v21 = vrot.slane %v658_v13, 1  ;;  %v764_v38 = vadd.f32 %v763_v29, %v761_v9  ;;  %v683_v40 = vadd.f32 %v1046_v62, %v486_v4 }
 0x103   : > { %600 = vst [vmem:[%s1238_s8 + $0x78] sm:$0xff] %v1049_v18  ;;  %616 = vst [vmem:[%s1238_s8 + $0xf8] sm:$0xff] %v1073_v19  ;;  %v496_v24 = vpop.f32.mrb[15].mxu0  ;;  %v576_v25 = vpop.f32.mrb[15].mxu1  ;;  %v692_v41 = vmul.f32 %v486_v4, %v486_v4  ;;  %v781_v42 = vmul.f32 %v1070_v63, %v1070_v63  ;;  %v1290_v44 = vadd.f32 %v710_v0, %v1266_v46  ;;  %v677_v48 = vrot.slane %v676_v36, 4 }
 0x104   : > { %599 = vst [vmem:[%s1238_s8 + $0x70] sm:$0xff] %v496_v24  ;;  %615 = vst [vmem:[%s1238_s8 + $0xf0] sm:$0xff] %v576_v25  ;;  %v660_v31 = vadd.f32 %v659_v21, %v658_v13  ;;  %v794_v32 = vsel %vm793_vm2, %v625_v6, %v647_v20  ;;  %v665_v47 = vadd.f32 %v664_v34, %v663_v26  ;;  %v765_v56 = vrot.slane %v764_v38, 4 }
 0x105   : > { %v731_v49 = vadd.f32 %v730_v7, %v1258_v35  ;;  %v696_v50 = vadd.f32 %v693_v33, %v692_v41  ;;  %v771_v51 = vadd.f32 %v1070_v63, %v566_v5  ;;  %v780_v52 = vmul.f32 %v566_v5, %v566_v5 }
 0x106   : > { %v807_v39 = vsel %vm793_vm2, %v638_v30, %v660_v31  ;;  %v744_v53 = vadd.f32 %v743_v22, %v1264_v43  ;;  %v666_v54 = vrot.slane %v665_v47, 2  ;;  %v678_v55 = vadd.f32 %v677_v48, %v676_v36 }
 0x107   : > { %v753_v57 = vadd.f32 %v752_v37, %v751_v28  ;;  %v784_v58 = vadd.f32 %v781_v42, %v780_v52  ;;  %v684_v59 = vadd.f32 %v683_v40, %v496_v24  ;;  %v694_v60 = vmul.f32 %v496_v24, %v496_v24 }
 0x108   : > { %v667_v46 = vadd.f32 %v666_v54, %v665_v47  ;;  %v679_v61 = vrot.slane %v678_v55, 2  ;;  %v695_v62 = vmul.f32 %v1049_v18, %v1049_v18  ;;  %v783_v0 = vmul.f32 %v1073_v19, %v1073_v19 }
 0x109   : > { %v685_v2 = vadd.f32 %v1049_v18, %v684_v59  ;;  %v697_v3 = vadd.f32 %v696_v50, %v694_v60  ;;  %v772_v4 = vadd.f32 %v771_v51, %v576_v25  ;;  %v782_v35 = vmul.f32 %v576_v25, %v576_v25 }
 0x10a   : > { %v732_v6 = vrot.slane %v731_v49, 2  ;;  %v668_v63 = vrot.slane %v667_v46, 1  ;;  %v680_v5 = vadd.f32 %v679_v61, %v678_v55  ;;  %v766_v7 = vadd.f32 %v765_v56, %v764_v38 }
 0x10b   : > { %v686_v43 = vrot.slane %v685_v2, 4  ;;  %v698_v8 = vadd.f32 %v697_v3, %v695_v62  ;;  %v773_v10 = vadd.f32 %v1073_v19, %v772_v4  ;;  %v785_v11 = vadd.f32 %v784_v58, %v782_v35 }
 0x10c   : > { %v745_v12 = vrot.slane %v744_v53, 2  ;;  %v669_v13 = vadd.f32 %v668_v63, %v667_v46  ;;  %v681_v9 = vrot.slane %v680_v5, 1  ;;  %v754_v14 = vrot.slane %v753_v57, 2 }
 0x10d   : > { %v687_v15 = vadd.f32 %v686_v43, %v685_v2  ;;  %v699_v16 = vrot.slane %v698_v8, 4  ;;  %v774_v17 = vrot.slane %v773_v10, 4  ;;  %v786_v18 = vadd.f32 %v785_v11, %v783_v0 }
 0x10e   : > { %v733_v20 = vadd.f32 %v732_v6, %v731_v49  ;;  %v682_v21 = vadd.f32 %v681_v9, %v680_v5  ;;  %v796_v22 = vsel %vm795_vm3, %v794_v32, %v669_v13  ;;  %v767_v23 = vrot.slane %v766_v7, 2 }
 0x10f   : > { %v688_v24 = vrot.slane %v687_v15, 2  ;;  %v700_v25 = vadd.f32 %v699_v16, %v698_v8  ;;  %v775_v19 = vadd.f32 %v774_v17, %v773_v10  ;;  %v787_v26 = vrot.slane %v786_v18, 4 }
 0x110   : > { %v724_v27 = vadd.f32 %v723_v45, %v1275_v1  ;;  %v746_v28 = vadd.f32 %v745_v12, %v744_v53  ;;  %v808_v29 = vsel %vm795_vm3, %v807_v39, %v682_v21  ;;  %v755_v30 = vadd.f32 %v754_v14, %v753_v57 }
 0x111   : > { %v689_v31 = vadd.f32 %v688_v24, %v687_v15  ;;  %v701_v33 = vrot.slane %v700_v25, 2  ;;  %v776_v34 = vrot.slane %v775_v19, 2  ;;  %v788_v36 = vadd.f32 %v787_v26, %v786_v18 }
 0x112   : > { %v712_v32 = vrot.slane %v1290_v44, 1  ;;  %v734_v37 = vrot.slane %v733_v20, 1  ;;  %v768_v38 = vadd.f32 %v767_v23, %v766_v7  ;;  %v725_v45 = vrot.slane %v724_v27, 1 }
 0x113   : > { %v690_v40 = vrot.slane %v689_v31, 1  ;;  %v702_v41 = vadd.f32 %v701_v33, %v700_v25  ;;  %v777_v42 = vadd.f32 %v776_v34, %v775_v19  ;;  %v789_v1 = vrot.slane %v788_v36, 2 }
 0x114   : > { %v747_v47 = vrot.slane %v746_v28, 1  ;;  %v756_v39 = vrot.slane %v755_v30, 1  ;;  %v713_v52 = vadd.f32 %v712_v32, %v1290_v44  ;;  %v769_v53 = vrot.slane %v768_v38, 1 }
 0x115   : > { %v691_v48 = vadd.f32 %v690_v40, %v689_v31  ;;  %v703_v49 = vrot.slane %v702_v41, 1  ;;  %v778_v50 = vrot.slane %v777_v42, 1  ;;  %v790_v51 = vadd.f32 %v789_v1, %v788_v36 }
 0x116   : > { %v735_v54 = vadd.f32 %v734_v37, %v733_v20  ;;  %v726_v58 = vadd.f32 %v725_v45, %v724_v27  ;;  %v757_v59 = vadd.f32 %v756_v39, %v755_v30  ;;  %v748_v46 = vadd.f32 %v747_v47, %v746_v28 }
 0x117   : > { %v704_v55 = vadd.f32 %v703_v49, %v702_v41  ;;  %v798_v56 = vsel %vm797_vm4, %v796_v22, %v691_v48  ;;  %v791_v57 = vrot.slane %v790_v51, 1  ;;  %v779_v44 = vadd.f32 %v778_v50, %v777_v42 }
 0x118   : > { %v799_v60 = vsel %vm356_vm0, %v798_v56, %v713_v52  ;;  %v770_v0 = vadd.f32 %v769_v53, %v768_v38 }
 0x119   : > { %v809_v61 = vsel %vm797_vm4, %v808_v29, %v704_v55  ;;  %v801_v62 = vsel %vm800_vm5, %v799_v60, %v735_v54  ;;  %v792_v4 = vadd.f32 %v791_v57, %v790_v51 }
 0x11a   : > { %v810_v2 = vsel %vm356_vm0, %v809_v61, %v726_v58  ;;  %v803_v3 = vsel %vm802_vm6, %v801_v62, %v757_v59 }
 0x11b   : > { %v805_v35 = vsel %vm804_vm7, %v803_v3, %v779_v44  ;;  %v811_v6 = vsel %vm800_vm5, %v810_v2, %v748_v46 }
 0x11c   : > { %806 = vst [vmem:[%s217_s12] sm:$0xff] %v805_v35  ;;  %v812_v63 = vsel %vm802_vm6, %v811_v6, %v770_v0 }
 0x11d   : > { %v813_v5 = vsel %vm804_vm7, %v812_v63, %v792_v4 }
 0x11e   : > { %814 = vst [vmem:[%s221_s16] sm:$0xff] %v813_v5 }
 0x11f PF: > { %s15_s15 = sadd.s32 1, %s1102_s15  }
 0x120   : > { %p12_p5 = scmp.ge.s32.totalorder %s15_s15, 4  }
 0x122   :  { %14 = sbr.rel (!%p12_p5) target bundleno = 1 (0x1), region = 82 }

</bundles_post_ra>
